<compile_context>
chip_gen: v7x
topology: tpu7x:2x2x1
jax: 0.10.0
libtpu: 0.0.40
codegen_flags: <defaults>
</compile_context>

<pallas_src>
import functools

import jax
import jax.numpy as jnp
from jax.experimental import pallas as pl
from jax.experimental.pallas import tpu as pltpu

LANE = 128


def _round_up(a: int, b: int) -> int:
    return (a + b - 1) // b * b


def neuralnet_fwd_kernel(stats_ref, x_ref, w1_ref, b1_ref, w2_ref, b2_ref, o_ref):
    # stats_ref: SMEM f32[2] = [global_mean, global_inv_std]  (hoisted stats)
    mean = stats_ref[0]
    inv_std = stats_ref[1]

    x = x_ref[...].astype(jnp.float32)            # (tm, in_size)
    xn = (x - mean) * inv_std                     # global normalization

    # Linear(in_size, 32) + ReLU  (hidden padded to 128 lanes; pad cols are 0)
    h = jnp.dot(xn, w1_ref[...], preferred_element_type=jnp.float32) + b1_ref[...]
    h = jnp.maximum(h, 0.0)

    # Linear(32, out_size)  (computed 128 lanes wide for MXU friendliness,
    # then only the real out_size columns are stored -> no padded writeback).
    y = jnp.dot(h, w2_ref[...], preferred_element_type=jnp.float32) + b2_ref[...]
    out_cols = o_ref.shape[-1]
    o_ref[...] = y[:, :out_cols].astype(o_ref.dtype)


def pack_params(w1, b1, w2, b2):
    """One-time (model-load) preparation: transpose + lane-pad the weights.

    PyTorch Linear shapes: w (out, in), b (out,).  Hoisted out of the forward
    path so no zeros/scatter/transpose ops are dispatched per call.
    """
    hidden, in_size = w1.shape
    out_size = w2.shape[0]
    hid_p = _round_up(hidden, LANE)
    out_p = _round_up(out_size, LANE)

    w1_t = jnp.zeros((in_size, hid_p), jnp.float32).at[:, :hidden].set(
        w1.T.astype(jnp.float32))
    b1_p = jnp.zeros((1, hid_p), jnp.float32).at[:, :hidden].set(
        b1.astype(jnp.float32))
    w2_t = jnp.zeros((hid_p, out_p), jnp.float32).at[:hidden, :out_size].set(
        w2.T.astype(jnp.float32))
    b2_p = jnp.zeros((1, out_p), jnp.float32).at[:, :out_size].set(
        b2.astype(jnp.float32))
    return w1_t, b1_p, w2_t, b2_p, out_size


@functools.partial(jax.jit, static_argnames=("out_size", "tm_max"))
def neuralnet_forward(x, w1_t, b1_p, w2_t, b2_p, *, out_size, tm_max=4096):
    """x: (N, in_size) -> (N, out_size), matching NeuralNet.forward."""
    N, in_size = x.shape
    hid_p = w1_t.shape[1]
    out_p = w2_t.shape[1]

    xf = x.astype(jnp.float32)

    # ---- single-pass global stats (one HBM read of x, fused by XLA) --------
    n_elems = N * in_size
    s1 = jnp.sum(xf)
    s2 = jnp.sum(xf * xf)
    mean = s1 / n_elems
    var = (s2 - s1 * mean) / (n_elems - 1)        # unbiased (ddof=1)
    inv_std = jax.lax.rsqrt(var)
    stats = jnp.stack([mean, inv_std]).astype(jnp.float32)   # (2,) -> SMEM

    # ---- row tiling: no x padding, no output padding ------------------------
    # Keep >= 2 grid steps when possible so v7x can shard across its 2 TCs.
    tm = max(8, min(tm_max, _round_up(pl.cdiv(N, 2), 8)))
    grid = (pl.cdiv(N, tm),)     # tail block reads/writes are bounds-handled

    out = pl.pallas_call(
        neuralnet_fwd_kernel,
        out_shape=jax.ShapeDtypeStruct((N, out_size), jnp.float32),
        grid=grid,
        in_specs=[
            pl.BlockSpec(memory_space=pltpu.MemorySpace.SMEM),     # stats
            pl.BlockSpec((tm, in_size), lambda i: (i, 0)),         # x rows
            pl.BlockSpec((in_size, hid_p), lambda i: (0, 0)),      # W1^T (resident)
            pl.BlockSpec((1, hid_p), lambda i: (0, 0)),            # b1   (resident)
            pl.BlockSpec((hid_p, out_p), lambda i: (0, 0)),        # W2^T (resident)
            pl.BlockSpec((1, out_p), lambda i: (0, 0)),            # b2   (resident)
        ],
        out_specs=pl.BlockSpec((tm, out_size), lambda i: (i, 0)),  # un-padded store
        compiler_params=pltpu.CompilerParams(
            dimension_semantics=("parallel",),
            vmem_limit_bytes=32 * 1024 * 1024,
        ),
    )(stats, xf, w1_t, b1_p, w2_t, b2_p)

    return out


def _reference(x, w1, b1, w2, b2):
    mean = x.mean()
    std = jnp.std(x, ddof=1)
    xn = (x - mean) / std
    return jnp.maximum(xn @ w1.T + b1, 0.0) @ w2.T + b2


if __name__ == "__main__":
    # Small shapes consistent with the module's forward: x is (N, in_size).
    N, in_size, hidden, out_size = 8, 16, 32, 4

    key = jax.random.PRNGKey(0)
    kx, kw1, kb1, kw2, kb2 = jax.random.split(key, 5)

    x = jax.random.normal(kx, (N, in_size), dtype=jnp.float32)

    # PyTorch Linear init ranges: U(-1/sqrt(fan_in), 1/sqrt(fan_in)).
    bound1 = 1.0 / (in_size ** 0.5)
    w1 = jax.random.uniform(kw1, (hidden, in_size), jnp.float32, -bound1, bound1)
    b1 = jax.random.uniform(kb1, (hidden,), jnp.float32, -bound1, bound1)
    bound2 = 1.0 / (hidden ** 0.5)
    w2 = jax.random.uniform(kw2, (out_size, hidden), jnp.float32, -bound2, bound2)
    b2 = jax.random.uniform(kb2, (out_size,), jnp.float32, -bound2, bound2)

    # One-time parameter prep (hoisted out of the per-call path).
    w1_t, b1_p, w2_t, b2_p, osz = pack_params(w1, b1, w2, b2)

    out = neuralnet_forward(x, w1_t, b1_p, w2_t, b2_p, out_size=osz)
    jax.block_until_ready(out)
    ref = _reference(x, w1, b1, w2, b2)
    assert out.shape == (N, out_size)
    assert jnp.allclose(out, ref, atol=5e-4, rtol=5e-4)

    # Larger batch: exercises the multi-step parallel grid (2 tiles of 504
    # rows) and the out-of-bounds tail-block handling (rows 1000..1007 of the
    # last tile are garbage and are dropped on writeback).
    N2 = 1000
    x2 = jax.random.normal(jax.random.PRNGKey(1), (N2, in_size), dtype=jnp.float32)
    out2 = neuralnet_forward(x2, w1_t, b1_p, w2_t, b2_p, out_size=osz)
    jax.block_until_ready(out2)
    ref2 = _reference(x2, w1, b1, w2, b2)
    assert out2.shape == (N2, out_size)
    assert jnp.allclose(out2, ref2, atol=5e-4, rtol=5e-4)

    print("KERNEL_OK")
</pallas_src>

<mosaic_0001>
module attributes {stable_mosaic.version = 11 : i64} {
  func.func @neuralnet_fwd_kernel(%arg0: i32, %arg1: memref<2xf32, #tpu.memory_space<smem>>, %arg2: memref<8x16xf32, #tpu.memory_space<vmem>>, %arg3: memref<16x128xf32, #tpu.memory_space<vmem>>, %arg4: memref<1x128xf32, #tpu.memory_space<vmem>>, %arg5: memref<128x128xf32, #tpu.memory_space<vmem>>, %arg6: memref<1x128xf32, #tpu.memory_space<vmem>>, %arg7: memref<8x4xf32, #tpu.memory_space<vmem>>) attributes {dimension_semantics = [#tpu.dimension_semantics<parallel>], iteration_bounds = array<i64: 1>, scalar_prefetch = 0 : i64, scratch_operands = 0 : i64, tpu.core_type = #tpu.core_type<tc>, window_params = [{transform_indices = @transform_0, window_bounds = array<i64: 2>}, {transform_indices = @transform_1, window_bounds = array<i64: 8, 16>}, {pipeline_mode = #tpu.pipeline_mode<synchronous>, transform_indices = @transform_2, window_bounds = array<i64: 16, 128>}, {pipeline_mode = #tpu.pipeline_mode<synchronous>, transform_indices = @transform_3, window_bounds = array<i64: 1, 128>}, {pipeline_mode = #tpu.pipeline_mode<synchronous>, transform_indices = @transform_4, window_bounds = array<i64: 128, 128>}, {pipeline_mode = #tpu.pipeline_mode<synchronous>, transform_indices = @transform_5, window_bounds = array<i64: 1, 128>}, {transform_indices = @transform_6, window_bounds = array<i64: 8, 4>}]} {
    %c0 = arith.constant 0 : index
    %0 = memref.load %arg1[%c0] : memref<2xf32, #tpu.memory_space<smem>>
    %c1 = arith.constant 1 : index
    %1 = memref.load %arg1[%c1] : memref<2xf32, #tpu.memory_space<smem>>
    %c0_0 = arith.constant 0 : index
    %c0_1 = arith.constant 0 : index
    %2 = vector.load %arg2[%c0_0, %c0_1] : memref<8x16xf32, #tpu.memory_space<vmem>>, vector<8x16xf32>
    %3 = vector.broadcast %0 : f32 to vector<8x16xf32>
    %4 = arith.subf %2, %3 : vector<8x16xf32>
    %5 = vector.broadcast %1 : f32 to vector<8x16xf32>
    %6 = arith.mulf %4, %5 : vector<8x16xf32>
    %c0_2 = arith.constant 0 : index
    %c0_3 = arith.constant 0 : index
    %7 = vector.load %arg3[%c0_2, %c0_3] : memref<16x128xf32, #tpu.memory_space<vmem>>, vector<16x128xf32>
    %cst = arith.constant dense<0.000000e+00> : vector<8x128xf32>
    %8 = tpu.matmul %6, %7, %cst {dimension_numbers = #tpu.dot_dimension_numbers<[1], [0], [0], [1], [0, 0, 1, 1], [], []>} : vector<8x16xf32>, vector<16x128xf32>, vector<8x128xf32> -> vector<8x128xf32>
    %c0_4 = arith.constant 0 : index
    %c0_5 = arith.constant 0 : index
    %9 = vector.load %arg4[%c0_4, %c0_5] : memref<1x128xf32, #tpu.memory_space<vmem>>, vector<1x128xf32>
    %10 = vector.broadcast %9 : vector<1x128xf32> to vector<8x128xf32>
    %11 = arith.addf %8, %10 : vector<8x128xf32>
    %cst_6 = arith.constant 0.000000e+00 : f32
    %12 = vector.broadcast %cst_6 : f32 to vector<8x128xf32>
    %13 = arith.maximumf %11, %12 : vector<8x128xf32>
    %c0_7 = arith.constant 0 : index
    %c0_8 = arith.constant 0 : index
    %14 = vector.load %arg5[%c0_7, %c0_8] : memref<128x128xf32, #tpu.memory_space<vmem>>, vector<128x128xf32>
    %cst_9 = arith.constant dense<0.000000e+00> : vector<8x128xf32>
    %15 = tpu.matmul %13, %14, %cst_9 {dimension_numbers = #tpu.dot_dimension_numbers<[1], [0], [0], [1], [0, 0, 1, 1], [], []>} : vector<8x128xf32>, vector<128x128xf32>, vector<8x128xf32> -> vector<8x128xf32>
    %c0_10 = arith.constant 0 : index
    %c0_11 = arith.constant 0 : index
    %16 = vector.load %arg6[%c0_10, %c0_11] : memref<1x128xf32, #tpu.memory_space<vmem>>, vector<1x128xf32>
    %17 = vector.broadcast %16 : vector<1x128xf32> to vector<8x128xf32>
    %18 = arith.addf %15, %17 : vector<8x128xf32>
    %19 = vector.extract_strided_slice %18 {offsets = [0, 0], sizes = [8, 4], strides = [1, 1]} : vector<8x128xf32> to vector<8x4xf32>
    %c0_12 = arith.constant 0 : index
    %c0_13 = arith.constant 0 : index
    %20 = vector.load %arg7[%c0_12, %c0_13] : memref<8x4xf32, #tpu.memory_space<vmem>>, vector<8x4xf32>
    tpu.vector_store %arg7[%c0_12, %c0_13], %19 {strides = array<i32>} : memref<8x4xf32, #tpu.memory_space<vmem>>, vector<8x4xf32>,
    return
  }
  func.func @transform_0(%arg0: i32) -> i32 {
    %c0_i32 = arith.constant 0 : i32
    %c0_i32_0 = arith.constant 0 : i32
    return %c0_i32 : i32
  }
  func.func @transform_1(%arg0: i32) -> (i32, i32) {
    %c0_i32 = arith.constant 0 : i32
    %c0_i32_0 = arith.constant 0 : i32
    return %arg0, %c0_i32 : i32, i32
  }
  func.func @transform_2(%arg0: i32) -> (i32, i32) {
    %c0_i32 = arith.constant 0 : i32
    %c0_i32_0 = arith.constant 0 : i32
    %c0_i32_1 = arith.constant 0 : i32
    return %c0_i32, %c0_i32_0 : i32, i32
  }
  func.func @transform_3(%arg0: i32) -> (i32, i32) {
    %c0_i32 = arith.constant 0 : i32
    %c0_i32_0 = arith.constant 0 : i32
    %c0_i32_1 = arith.constant 0 : i32
    return %c0_i32, %c0_i32_0 : i32, i32
  }
  func.func @transform_4(%arg0: i32) -> (i32, i32) {
    %c0_i32 = arith.constant 0 : i32
    %c0_i32_0 = arith.constant 0 : i32
    %c0_i32_1 = arith.constant 0 : i32
    return %c0_i32, %c0_i32_0 : i32, i32
  }
  func.func @transform_5(%arg0: i32) -> (i32, i32) {
    %c0_i32 = arith.constant 0 : i32
    %c0_i32_0 = arith.constant 0 : i32
    %c0_i32_1 = arith.constant 0 : i32
    return %c0_i32, %c0_i32_0 : i32, i32
  }
  func.func @transform_6(%arg0: i32) -> (i32, i32) {
    %c0_i32 = arith.constant 0 : i32
    %c0_i32_0 = arith.constant 0 : i32
    return %arg0, %c0_i32 : i32, i32
  }
}

</mosaic_0001>

<bundles_post_ra>
// kernel: neuralnet_forward.1
= control target key start
LH: loop header
LB: loop body
LE: loop exit
PB: predicated region body
PF: predicated region fallthrough
CT: control target
= control target key end

     0   :  { %11 = vsyncpa [#allocation4], 0  ;;  %s455_s0 = inlined_call_operand.vmem [shape: f32[2], index: 0, kind: input, shape index: {}]   ;;  %s456_s1 = inlined_call_operand.vmem [shape: f32[8,16], index: 1, kind: input, shape index: {}]   ;;  %s457_s2 = inlined_call_operand.vmem [shape: f32[16,128], index: 2, kind: input, shape index: {}]   ;;  %s458_s3 = inlined_call_operand.vmem [shape: f32[1,128], index: 3, kind: input, shape index: {}]   ;;  %s459_s4 = inlined_call_operand.hbm [shape: f32[128,128], index: 4, kind: input, shape index: {}]   ;;  %s460_s5 = inlined_call_operand.vmem [shape: f32[1,128], index: 5, kind: input, shape index: {}]   ;;  %s461_s6 = inlined_call_operand.vmem [shape: f32[8,4], index: 6, kind: output, shape index: {}]  }
   0x1   :  { %s19_s23 = sshll.u32 %s455_s0, 4  ;;  %s20_s23 = int_to_ptr.vmem [resolvable:$true] %s19_s23 }
   0x2   :  { %12 = vsyncpa [#allocation3], 0  ;;  %s342_s24 = scalar_lea.vmem %s20_s23, 16  ;;  %p347_p1 = scmp.lt.s32.totalorder %s20_s23, %s20_s23 }
   0x3   :  { %p343_p0 = scmp.ne.s32.totalorder %s20_s23, %s342_s24  ;;  %p348_p2 = scmp.lt.s32.totalorder %s342_s24, %s342_s24 }
   0x5   :  { %p349_p3 = por %p348_p2, %p347_p1 }
   0x7   :  { %p350_p4 = pnand %p349_p3, %p343_p0 }
   0x9   :  { %353 = shalt.err (!%p350_p4)
}
   0xa   :  { %s380_s25 = smov [#allocation2]   ;;  %s381_s26 = smov [#allocation5]  }
   0xb   :  { %22 = dma.vmem_to_smem %s20_s23, 16, %s380_s25, [#allocation4]  }
   0xc   :  { %s34_s27 = sshll.u32 %s381_s26, 4  ;;  %s354_s30 = scalar_lea.hbm %s459_s4, 2048  ;;  %s35_s27 = int_to_ptr.vmem [resolvable:$true] %s34_s27 }
   0xd   :  { %p355_p5 = scmp.ne.s32.totalorder %s459_s4, %s354_s30  ;;  %p358_p6 = scmp.lt.u32.totalorder %s354_s30, %s459_s4 }
   0xf   :  { %p360_p7 = pnand %p358_p6, %p355_p5 }
  0x11   :  { %363 = shalt.err (!%p360_p7)
}
  0x12   :  { %s364_s10 = scalar_lea.vmem %s35_s27, 2048  ;;  %p369_p9 = scmp.lt.s32.totalorder %s35_s27, %s35_s27 }
  0x13   :  { %p365_p8 = scmp.ne.s32.totalorder %s35_s27, %s364_s10  ;;  %p370_p10 = scmp.lt.s32.totalorder %s364_s10, %s364_s10 }
  0x15   :  { %p371_p11 = por %p370_p10, %p369_p9 }
  0x17   :  { %p372_p12 = pnand %p371_p11, %p365_p8 }
  0x19   :  { %375 = shalt.err (!%p372_p12)
}
  0x1a   :  { %s382_s11 = smov 128   ;;  %s383_s12 = smov 8  }
  0x1b   :  { %40 = dma.hbm_to_vmem [thread:$0]  %s459_s4, 2048, %s35_s27, [#allocation3], %s382_s11, %s382_s11, %s383_s12  }
  0x1c   :  { %376 = dma.done.wait [#allocation4], 16  }
  0x1d   :  { %377 = vsyncadd [#allocation4], 4294967280 }
  0x1e   :  { %378 = dma.done.wait [#allocation3], 2048  }
  0x1f   :  { %379 = vsyncadd [#allocation3], 4294965248 }
  0x20   :  { %49 = sfence }
  0x21   :  { %v57_v0 = vld [vmem:[%s457_s2] sm:$0xff]  ;;  %v58_v1 = vld [vmem:[%s457_s2 + $0x8] sm:$0xff]  ;;  %v384_v2 = vmov 0.0|0.0   ;;  %vm385_vm0 = vmmov 0   ;;  %v386_v4 = vmov 0.0   ;;  %s50_s4 = sld [smem:[#allocation2]] }
  0x22   :  { %308 = vmatprep.subr.bf16.mxu0 %v384_v2  ;;  %v309_v3 = vpack.c.bf16 %v58_v1, %v57_v0  ;;  %270 = vmatprep.mubr.msk.f32.mxu0 %vm385_vm0, %v386_v4  ;;  %s242_s19 = sld [smem:[#allocation2 + $0x1]]  ;;  %v141_v5 = vld [vmem:[#allocation5] sm:$0xff]  ;;  %v142_v6 = vld [vmem:[#allocation5 + $0x8] sm:$0xff]  ;;  %v143_v7 = vld [vmem:[#allocation5 + $0x10] sm:$0xff]  ;;  %vm66_vm1 = vcmask 130048   ;;  %vm234_vm2 = vcmask 31744  }
  0x23   :  { %311 = vmatprep.subr.bf16.mxu1 %v384_v2  ;;  %v144_v8 = vld [vmem:[#allocation5 + $0x18] sm:$0xff]  ;;  %305 = vmatprep.mubr.msk.f32.mxu1 %vm385_vm0, %v386_v4  ;;  %v312_v9 = vpack.c.bf16 %v142_v6, %v141_v5  ;;  %v52_v10 = vld [vmem:[%s456_s1] sm:$0xff]  ;;  %v146_v13 = vld [vmem:[#allocation5 + $0x28] sm:$0xff] }
  0x24   :  { %310 = vmatpush3.bf16.msra.mxu0 %v309_v3  ;;  %v315_v11 = vpack.c.bf16 %v144_v8, %v143_v7  ;;  %v145_v12 = vld [vmem:[#allocation5 + $0x20] sm:$0xff]  ;;  %v147_v19 = vld [vmem:[#allocation5 + $0x30] sm:$0xff]  ;;  %v148_v20 = vld [vmem:[#allocation5 + $0x38] sm:$0xff] }
  0x25   :  { %313 = vmatpush3.bf16.msra.mxu1 %v312_v9  ;;  %v318_v17 = vpack.c.bf16 %v146_v13, %v145_v12  ;;  %v321_v21 = vpack.c.bf16 %v148_v20, %v147_v19  ;;  %v149_v22 = vld [vmem:[#allocation5 + $0x40] sm:$0xff]  ;;  %v150_v23 = vld [vmem:[#allocation5 + $0x48] sm:$0xff]  ;;  %v151_v25 = vld [vmem:[#allocation5 + $0x50] sm:$0xff] }
  0x26   :  { %314 = vmatprep.subr.bf16.mxu1 %v384_v2  ;;  %v324_v24 = vpack.c.bf16 %v150_v23, %v149_v22  ;;  %v152_v26 = vld [vmem:[#allocation5 + $0x58] sm:$0xff]  ;;  %v153_v28 = vld [vmem:[#allocation5 + $0x60] sm:$0xff]  ;;  %v154_v29 = vld [vmem:[#allocation5 + $0x68] sm:$0xff] }
  0x27   :  { %v53_v14 = vstv %s50_s4  ;;  %v327_v27 = vpack.c.bf16 %v152_v26, %v151_v25  ;;  %v330_v30 = vpack.c.bf16 %v154_v29, %v153_v28  ;;  %v155_v31 = vld [vmem:[#allocation5 + $0x70] sm:$0xff]  ;;  %v156_v32 = vld [vmem:[#allocation5 + $0x78] sm:$0xff]  ;;  %v243_v34 = vld [vmem:[%s458_s3] ss:$0 sm:$0xff] }
  0x28   :  { %v55_v15 = vstv %s242_s19  ;;  %v54_v16 = vsub.f32 %v52_v10, %v53_v14  ;;  %v333_v33 = vpack.c.bf16 %v156_v32, %v155_v31  ;;  %v245_v39 = vld [vmem:[%s460_s5] ss:$0 sm:$0xff] }
  0x29   :  { %316 = vmatpush3.bf16.msra.mxu1 %v315_v11 }
  0x2a   :  { %v56_v18 = vmul.f32 %v55_v15, %v54_v16  ;;  %317 = vmatprep.subr.bf16.mxu1 %v384_v2 }
  0x2c   :  { %271 = vmatmul.mubr.msk.f32.vlgmr.msra.gmra.mrb[0].mxu0 %vm66_vm1, %v56_v18 }
  0x2d   :  { %319 = vmatpush3.bf16.msra.mxu1 %v318_v17 }
  0x2e   :  { %320 = vmatprep.subr.bf16.mxu1 %v384_v2 }
  0x31   :  { %322 = vmatpush3.bf16.msra.mxu1 %v321_v21 }
  0x32   :  { %323 = vmatprep.subr.bf16.mxu1 %v384_v2 }
  0x35   :  { %325 = vmatpush3.bf16.msra.mxu1 %v324_v24 }
  0x36   :  { %326 = vmatprep.subr.bf16.mxu1 %v384_v2 }
  0x39   :  { %328 = vmatpush3.bf16.msra.mxu1 %v327_v27 }
  0x3a   :  { %329 = vmatprep.subr.bf16.mxu1 %v384_v2 }
  0x3d   :  { %331 = vmatpush3.bf16.msra.mxu1 %v330_v30 }
  0x3e   :  { %332 = vmatprep.subr.bf16.mxu1 %v384_v2 }
  0x41   :  { %334 = vmatpush3.bf16.msra.mxu1 %v333_v33 }
  0xff   :  { %v136_v35 = vpop.f32.mrb[0].mxu0 }
 0x100   :  { %v137_v36 = vadd.f32 %v243_v34, %v136_v35  ;;  %v272_v37 = vpop.f32.mrb[1].mxu0 }
 0x102   :  { %v140_v38 = vmax.f32 %v137_v36, 0.0 }
 0x104   :  { %306 = vmatmul.mubr.f32.vlgmr.msra.gmra.mrb[0].mxu1 %v140_v38 }
 0x1d7   :  { %v230_v40 = vpop.f32.mrb[0].mxu1 }
 0x1d8   :  { %v231_v41 = vadd.f32 %v245_v39, %v230_v40  ;;  %v307_v42 = vpop.f32.mrb[1].mxu1 }
 0x1da   :  { %235 = vst.msk [vmem:[%s461_s6] sm:$0xff] %vm234_vm2, %v231_v41 }
 0x1db   :  { %240 = vsyncpa [#allocation3], 1 }
 0x1dc   :  { %241 = vsyncpa [#allocation4], 1 }

</bundles_post_ra>
